<compile_context>
chip_gen: v7x
topology: tpu7x:2x2x1
jax: 0.10.0
libtpu: 0.0.40
codegen_flags: <defaults>
</compile_context>

<pallas_src>
import functools

import jax
import jax.numpy as jnp
from jax.experimental import pallas as pl
from jax.experimental.pallas import tpu as pltpu


def _odefunc_kernel(x_ref, w1_ref, b1_ref, w2_ref, b2_ref, w3_ref, b3_ref,
                    o_ref, *, n_chunks):
    """Fused 3-layer MLP forward on one batch tile.

    The tile is split into `n_chunks` row chunks (static unroll) so the MXU
    (vector-extended slot) of the next chunk overlaps the EUP tanh of the
    previous chunk instead of running one serial mm->tanh->mm->tanh->mm chain.
    """
    # Weights are bf16 (native MXU rate), biases f32.
    w1 = w1_ref[...]
    w2 = w2_ref[...]
    w3 = w3_ref[...]
    b1 = b1_ref[...]
    b2 = b2_ref[...]
    b3 = b3_ref[...]

    tm = x_ref.shape[0]
    cm = tm // n_chunks
    for c in range(n_chunks):          # static slices -> no runtime cost
        lo, hi = c * cm, (c + 1) * cm
        xs = x_ref[lo:hi, :].astype(jnp.bfloat16)
        # Linear(n_inputs -> n_units) + Tanh
        h = jnp.dot(xs, w1, preferred_element_type=jnp.float32) + b1
        h = jnp.tanh(h)
        # Dropout(ode_dropout) -> identity in eval mode
        # Linear(n_units -> n_units) + Tanh
        h = jnp.dot(h.astype(jnp.bfloat16), w2,
                    preferred_element_type=jnp.float32) + b2
        h = jnp.tanh(h)
        # Linear(n_units -> n_outputs)
        y = jnp.dot(h.astype(jnp.bfloat16), w3,
                    preferred_element_type=jnp.float32) + b3
        o_ref[lo:hi, :] = y.astype(o_ref.dtype)


def _round_up(n, m):
    return ((n + m - 1) // m) * m


def prepare_params(params):
    """One-time prep (hoisted out of the per-call path): cast weights to bf16
    for native-rate MXU matmuls; biases stay f32. Reuse across all RHS evals."""
    bf16 = jnp.bfloat16
    return {
        "w1": params["w1"].astype(bf16), "b1": params["b1"].astype(jnp.float32),
        "w2": params["w2"].astype(bf16), "b2": params["b2"].astype(jnp.float32),
        "w3": params["w3"].astype(bf16), "b3": params["b3"].astype(jnp.float32),
    }


def odefunc_net_forward(x, prepped, *, tm_max=4096):
    """x: (B, n_inputs) float32. prepped: output of prepare_params()."""
    w1, b1 = prepped["w1"], prepped["b1"]
    w2, b2 = prepped["w2"], prepped["b2"]
    w3, b3 = prepped["w3"], prepped["b3"]

    B, n_in = x.shape
    H = w1.shape[1]
    n_out = w3.shape[1]

    # Batch tile: multiple of 8 sublanes; >= 2 grid steps whenever B allows it
    # so v7x's two TensorCores both get work ("parallel" axis), capped at
    # tm_max to amortize the ~0.35us per-grid-step overhead at large B.
    if B <= 8:
        tm = 8                                   # can't split below sublane granularity
    else:
        tm = min(tm_max, _round_up(-(-B // 2), 8))
    Bp = _round_up(B, tm)

    # Only the batch dim may need padding (feature dims use full-dim blocks).
    xp = x if Bp == B else jnp.zeros((Bp, n_in), x.dtype).at[:B].set(x)

    # Intra-tile chunking: keep chunks sublane-aligned (multiple of 8 rows).
    if tm >= 256 and tm % 32 == 0:
        n_chunks = 4
    elif tm >= 64 and tm % 16 == 0:
        n_chunks = 2
    else:
        n_chunks = 1

    kernel = functools.partial(_odefunc_kernel, n_chunks=n_chunks)

    out = pl.pallas_call(
        kernel,
        out_shape=jax.ShapeDtypeStruct((Bp, n_out), jnp.float32),
        grid=(Bp // tm,),
        in_specs=[
            pl.BlockSpec((tm, n_in), lambda i: (i, 0)),   # x tile (streamed / pipelined)
            pl.BlockSpec((n_in, H), lambda i: (0, 0)),    # weights & biases stay
            pl.BlockSpec((1, H), lambda i: (0, 0)),       # VMEM-resident across
            pl.BlockSpec((H, H), lambda i: (0, 0)),       # the batch grid axis
            pl.BlockSpec((1, H), lambda i: (0, 0)),
            pl.BlockSpec((H, n_out), lambda i: (0, 0)),
            pl.BlockSpec((1, n_out), lambda i: (0, 0)),
        ],
        out_specs=pl.BlockSpec((tm, n_out), lambda i: (i, 0)),
        compiler_params=pltpu.CompilerParams(
            dimension_semantics=("parallel",),            # megacore split on v7x
            vmem_limit_bytes=32 * 1024 * 1024,            # explicit (v5e default is 16 MiB)
        ),
    )(xp, w1, b1, w2, b2, w3, b3)

    return out if Bp == B else out[:B]


def init_params(key, n_inputs, n_units, n_outputs, std=0.1):
    """Matches PlainNet.init_network_weights: W ~ N(0, std), b = 0.
    Weights stored as (in_features, out_features) = PyTorch weight.T."""
    k1, k2, k3 = jax.random.split(key, 3)
    return {
        "w1": std * jax.random.normal(k1, (n_inputs, n_units), jnp.float32),
        "b1": jnp.zeros((1, n_units), jnp.float32),
        "w2": std * jax.random.normal(k2, (n_units, n_units), jnp.float32),
        "b2": jnp.zeros((1, n_units), jnp.float32),
        "w3": std * jax.random.normal(k3, (n_units, n_outputs), jnp.float32),
        "b3": jnp.zeros((1, n_outputs), jnp.float32),
    }


def reference_forward(x, p):
    h = jnp.tanh(x @ p["w1"] + p["b1"])          # Linear + Tanh (Dropout = id)
    h = jnp.tanh(h @ p["w2"] + p["b2"])          # Linear + Tanh
    return h @ p["w3"] + p["b3"]                 # final Linear


if __name__ == "__main__":
    # ODEFuncNet(n_inputs=32, n_outputs=32, ode_dropout=0.1, n_layers=1, n_units=128)
    B, n_inputs, n_units, n_outputs = 8, 32, 128, 32

    key = jax.random.PRNGKey(0)
    kx, kp = jax.random.split(key)
    x = jax.random.normal(kx, (B, n_inputs), jnp.float32)
    params = init_params(kp, n_inputs, n_units, n_outputs, std=0.1)
    prepped = prepare_params(params)             # one-time weight prep (bf16)

    y = odefunc_net_forward(x, prepped)
    y = jax.block_until_ready(y)

    y_ref = reference_forward(x, params)
    assert y.shape == (B, n_outputs)
    # bf16 MXU operands -> looser tolerance than pure f32.
    assert jnp.allclose(y, y_ref, atol=3e-2, rtol=3e-2), "mismatch vs reference"

    # Exercise the multi-tile + batch-padding path too (2 grid steps, Bp > B).
    B2 = 20
    x2 = jax.random.normal(jax.random.PRNGKey(1), (B2, n_inputs), jnp.float32)
    y2 = jax.block_until_ready(odefunc_net_forward(x2, prepped))
    assert y2.shape == (B2, n_outputs)
    assert jnp.allclose(y2, reference_forward(x2, params), atol=3e-2, rtol=3e-2)

    print("KERNEL_OK")
</pallas_src>

<mosaic_0001>
module attributes {stable_mosaic.version = 11 : i64} {
  func.func @_odefunc_kernel(%arg0: i32, %arg1: memref<8x32xf32, #tpu.memory_space<vmem>>, %arg2: memref<32x128xbf16, #tpu.memory_space<vmem>>, %arg3: memref<1x128xf32, #tpu.memory_space<vmem>>, %arg4: memref<128x128xbf16, #tpu.memory_space<vmem>>, %arg5: memref<1x128xf32, #tpu.memory_space<vmem>>, %arg6: memref<128x32xbf16, #tpu.memory_space<vmem>>, %arg7: memref<1x32xf32, #tpu.memory_space<vmem>>, %arg8: memref<8x32xf32, #tpu.memory_space<vmem>>) attributes {dimension_semantics = [#tpu.dimension_semantics<parallel>], iteration_bounds = array<i64: 1>, scalar_prefetch = 0 : i64, scratch_operands = 0 : i64, tpu.core_type = #tpu.core_type<tc>, window_params = [{transform_indices = @transform_0, window_bounds = array<i64: 8, 32>}, {pipeline_mode = #tpu.pipeline_mode<synchronous>, transform_indices = @transform_1, window_bounds = array<i64: 32, 128>}, {pipeline_mode = #tpu.pipeline_mode<synchronous>, transform_indices = @transform_2, window_bounds = array<i64: 1, 128>}, {pipeline_mode = #tpu.pipeline_mode<synchronous>, transform_indices = @transform_3, window_bounds = array<i64: 128, 128>}, {pipeline_mode = #tpu.pipeline_mode<synchronous>, transform_indices = @transform_4, window_bounds = array<i64: 1, 128>}, {pipeline_mode = #tpu.pipeline_mode<synchronous>, transform_indices = @transform_5, window_bounds = array<i64: 128, 32>}, {pipeline_mode = #tpu.pipeline_mode<synchronous>, transform_indices = @transform_6, window_bounds = array<i64: 1, 32>}, {transform_indices = @transform_7, window_bounds = array<i64: 8, 32>}]} {
    %c0 = arith.constant 0 : index
    %c0_0 = arith.constant 0 : index
    %0 = vector.load %arg2[%c0, %c0_0] : memref<32x128xbf16, #tpu.memory_space<vmem>>, vector<32x128xbf16>
    %c0_1 = arith.constant 0 : index
    %c0_2 = arith.constant 0 : index
    %1 = vector.load %arg4[%c0_1, %c0_2] : memref<128x128xbf16, #tpu.memory_space<vmem>>, vector<128x128xbf16>
    %c0_3 = arith.constant 0 : index
    %c0_4 = arith.constant 0 : index
    %2 = vector.load %arg6[%c0_3, %c0_4] : memref<128x32xbf16, #tpu.memory_space<vmem>>, vector<128x32xbf16>
    %c0_5 = arith.constant 0 : index
    %c0_6 = arith.constant 0 : index
    %3 = vector.load %arg3[%c0_5, %c0_6] : memref<1x128xf32, #tpu.memory_space<vmem>>, vector<1x128xf32>
    %c0_7 = arith.constant 0 : index
    %c0_8 = arith.constant 0 : index
    %4 = vector.load %arg5[%c0_7, %c0_8] : memref<1x128xf32, #tpu.memory_space<vmem>>, vector<1x128xf32>
    %c0_9 = arith.constant 0 : index
    %c0_10 = arith.constant 0 : index
    %5 = vector.load %arg7[%c0_9, %c0_10] : memref<1x32xf32, #tpu.memory_space<vmem>>, vector<1x32xf32>
    %c0_11 = arith.constant 0 : index
    %c0_12 = arith.constant 0 : index
    %6 = vector.load %arg1[%c0_11, %c0_12] : memref<8x32xf32, #tpu.memory_space<vmem>>, vector<8x32xf32>
    %7 = arith.truncf %6 : vector<8x32xf32> to vector<8x32xbf16>
    %cst = arith.constant dense<0.000000e+00> : vector<8x128xf32>
    %8 = tpu.matmul %7, %0, %cst {dimension_numbers = #tpu.dot_dimension_numbers<[1], [0], [0], [1], [0, 0, 1, 1], [], []>} : vector<8x32xbf16>, vector<32x128xbf16>, vector<8x128xf32> -> vector<8x128xf32>
    %9 = vector.broadcast %3 : vector<1x128xf32> to vector<8x128xf32>
    %10 = arith.addf %8, %9 : vector<8x128xf32>
    %11 = math.tanh %10 : vector<8x128xf32>
    %12 = arith.truncf %11 : vector<8x128xf32> to vector<8x128xbf16>
    %cst_13 = arith.constant dense<0.000000e+00> : vector<8x128xf32>
    %13 = tpu.matmul %12, %1, %cst_13 {dimension_numbers = #tpu.dot_dimension_numbers<[1], [0], [0], [1], [0, 0, 1, 1], [], []>} : vector<8x128xbf16>, vector<128x128xbf16>, vector<8x128xf32> -> vector<8x128xf32>
    %14 = vector.broadcast %4 : vector<1x128xf32> to vector<8x128xf32>
    %15 = arith.addf %13, %14 : vector<8x128xf32>
    %16 = math.tanh %15 : vector<8x128xf32>
    %17 = arith.truncf %16 : vector<8x128xf32> to vector<8x128xbf16>
    %cst_14 = arith.constant dense<0.000000e+00> : vector<8x32xf32>
    %18 = tpu.matmul %17, %2, %cst_14 {dimension_numbers = #tpu.dot_dimension_numbers<[1], [0], [0], [1], [0, 0, 1, 1], [], []>} : vector<8x128xbf16>, vector<128x32xbf16>, vector<8x32xf32> -> vector<8x32xf32>
    %19 = vector.broadcast %5 : vector<1x32xf32> to vector<8x32xf32>
    %20 = arith.addf %18, %19 : vector<8x32xf32>
    %c0_15 = arith.constant 0 : index
    %c0_16 = arith.constant 0 : index
    %21 = vector.load %arg8[%c0_15, %c0_16] : memref<8x32xf32, #tpu.memory_space<vmem>>, vector<8x32xf32>
    tpu.vector_store %arg8[%c0_15, %c0_16], %20 {strides = array<i32>} : memref<8x32xf32, #tpu.memory_space<vmem>>, vector<8x32xf32>,
    return
  }
  func.func @transform_0(%arg0: i32) -> (i32, i32) {
    %c0_i32 = arith.constant 0 : i32
    %c0_i32_0 = arith.constant 0 : i32
    return %arg0, %c0_i32 : i32, i32
  }
  func.func @transform_1(%arg0: i32) -> (i32, i32) {
    %c0_i32 = arith.constant 0 : i32
    %c0_i32_0 = arith.constant 0 : i32
    %c0_i32_1 = arith.constant 0 : i32
    return %c0_i32, %c0_i32_0 : i32, i32
  }
  func.func @transform_2(%arg0: i32) -> (i32, i32) {
    %c0_i32 = arith.constant 0 : i32
    %c0_i32_0 = arith.constant 0 : i32
    %c0_i32_1 = arith.constant 0 : i32
    return %c0_i32, %c0_i32_0 : i32, i32
  }
  func.func @transform_3(%arg0: i32) -> (i32, i32) {
    %c0_i32 = arith.constant 0 : i32
    %c0_i32_0 = arith.constant 0 : i32
    %c0_i32_1 = arith.constant 0 : i32
    return %c0_i32, %c0_i32_0 : i32, i32
  }
  func.func @transform_4(%arg0: i32) -> (i32, i32) {
    %c0_i32 = arith.constant 0 : i32
    %c0_i32_0 = arith.constant 0 : i32
    %c0_i32_1 = arith.constant 0 : i32
    return %c0_i32, %c0_i32_0 : i32, i32
  }
  func.func @transform_5(%arg0: i32) -> (i32, i32) {
    %c0_i32 = arith.constant 0 : i32
    %c0_i32_0 = arith.constant 0 : i32
    %c0_i32_1 = arith.constant 0 : i32
    return %c0_i32, %c0_i32_0 : i32, i32
  }
  func.func @transform_6(%arg0: i32) -> (i32, i32) {
    %c0_i32 = arith.constant 0 : i32
    %c0_i32_0 = arith.constant 0 : i32
    %c0_i32_1 = arith.constant 0 : i32
    return %c0_i32, %c0_i32_0 : i32, i32
  }
  func.func @transform_7(%arg0: i32) -> (i32, i32) {
    %c0_i32 = arith.constant 0 : i32
    %c0_i32_0 = arith.constant 0 : i32
    return %arg0, %c0_i32 : i32, i32
  }
}

</mosaic_0001>

<bundles_post_ra>
// kernel: tpu_custom_call.1
= control target key start
LH: loop header
LB: loop body
LE: loop exit
PB: predicated region body
PF: predicated region fallthrough
CT: control target
= control target key end

     0   :  { %12 = vsyncpa [#allocation3], 0  ;;  %s673_s0 = inlined_call_operand.hbm [shape: f32[8,32], index: 0, kind: input, shape index: {}]   ;;  %s674_s1 = inlined_call_operand.vmem [shape: bf16[32,128], index: 1, kind: input, shape index: {}]   ;;  %s675_s2 = inlined_call_operand.vmem [shape: f32[1,128], index: 2, kind: input, shape index: {}]   ;;  %s676_s3 = inlined_call_operand.vmem [shape: bf16[128,128], index: 3, kind: input, shape index: {}]   ;;  %s677_s4 = inlined_call_operand.vmem [shape: f32[1,128], index: 4, kind: input, shape index: {}]   ;;  %s678_s5 = inlined_call_operand.vmem [shape: bf16[128,32], index: 5, kind: input, shape index: {}]   ;;  %s679_s6 = inlined_call_operand.vmem [shape: f32[1,32], index: 6, kind: input, shape index: {}]   ;;  %s680_s7 = inlined_call_operand.hbm [shape: f32[8,32], index: 7, kind: output, shape index: {}]  }
   0x1   :  { %13 = vsyncpa [#allocation4], 0  ;;  %s516_s24 = smov [#allocation2]   ;;  %s468_s28 = scalar_lea.hbm %s673_s0, 128 }
   0x2   :  { %s20_s25 = sshll.u32 %s516_s24, 4  ;;  %p469_p0 = scmp.ne.s32.totalorder %s673_s0, %s468_s28  ;;  %s21_s25 = int_to_ptr.vmem [resolvable:$true] %s20_s25 }
   0x3   :  { %p472_p1 = scmp.lt.u32.totalorder %s468_s28, %s673_s0 }
   0x5   :  { %p474_p2 = pnand %p472_p1, %p469_p0 }
   0x7   :  { %477 = shalt.err (!%p474_p2)
}
   0x8   :  { %s478_s10 = scalar_lea.vmem %s21_s25, 128  ;;  %p483_p4 = scmp.lt.s32.totalorder %s21_s25, %s21_s25 }
   0x9   :  { %p479_p3 = scmp.ne.s32.totalorder %s21_s25, %s478_s10  ;;  %p484_p5 = scmp.lt.s32.totalorder %s478_s10, %s478_s10 }
   0xb   :  { %p485_p6 = por %p484_p5, %p483_p4 }
   0xd   :  { %p486_p7 = pnand %p485_p6, %p479_p3 }
   0xf   :  { %489 = shalt.err (!%p486_p7)
}
  0x10   :  { %23 = dma.hbm_to_vmem [thread:$0]  %s673_s0, 128, %s21_s25, [#allocation3]  }
  0x11   :  { %512 = dma.done.wait [#allocation3], 128  }
  0x12   :  { %513 = vsyncadd [#allocation3], 4294967168  ;;  %v517_v0 = vmov 0.0   ;;  %vm518_vm0 = vmmov 0   ;;  %v446_v1 = vld [vmem:[%s674_s1] sm:$0xff]   ;;  %v447_v2 = vld [vmem:[%s674_s1 + $0x8] sm:$0xff]  }
  0x13   :  { %394 = vmatprep.subr.bf16.mxu0 %v517_v0  ;;  %398 = vmatprep.mubr.msk.bf16.mxu0 %vm518_vm0, %v517_v0  ;;  %v79_v3 = vld [vmem:[#allocation2] sm:$0xff]  ;;  %v449_v6 = vld [vmem:[%s676_s3 + $0x8] sm:$0xff]   ;;  %vm99_vm1 = vcmask 261120   ;;  %v450_v7 = vld [vmem:[%s676_s3 + $0x10] sm:$0xff]   ;;  %s519_s26 = smov [#allocation5]  }
  0x14   :  { %402 = vmatprep.subr.bf16.mxu1 %v517_v0  ;;  %418 = vmatprep.mubr.msk.bf16.mxu1 %vm518_vm0, %v517_v0  ;;  %v448_v4 = vld [vmem:[%s676_s3] sm:$0xff]   ;;  %v80_v5 = vpack.c.bf16 %v79_v3, %v79_v3  ;;  %v451_v8 = vld [vmem:[%s676_s3 + $0x18] sm:$0xff]   ;;  %v453_v10 = vld [vmem:[%s676_s3 + $0x28] sm:$0xff]  }
  0x15   :  { %395 = vmatpush3.bf16.msra.mxu0 %v446_v1  ;;  %403 = vmatpush3.bf16.msra.mxu1 %v448_v4  ;;  %v452_v9 = vld [vmem:[%s676_s3 + $0x20] sm:$0xff]   ;;  %v454_v11 = vld [vmem:[%s676_s3 + $0x30] sm:$0xff]   ;;  %v455_v12 = vld [vmem:[%s676_s3 + $0x38] sm:$0xff]  }
  0x16   :  { %396 = vmatprep.subr.bf16.mxu0 %v517_v0  ;;  %404 = vmatprep.subr.bf16.mxu1 %v517_v0  ;;  %v456_v13 = vld [vmem:[%s678_s5] sm:$0xff]   ;;  %v457_v14 = vld [vmem:[%s678_s5 + $0x8] sm:$0xff]   ;;  %v458_v15 = vld [vmem:[%s678_s5 + $0x10] sm:$0xff]  }
  0x17   :  { %v459_v16 = vld [vmem:[%s678_s5 + $0x18] sm:$0xff]   ;;  %v351_v17 = vld [vmem:[%s675_s2] ss:$0 sm:$0xff]  ;;  %v461_v26 = vld [vmem:[%s678_s5 + $0x28] sm:$0xff]  }
  0x18   :  { %v460_v25 = vld [vmem:[%s678_s5 + $0x20] sm:$0xff]   ;;  %v462_v27 = vld [vmem:[%s678_s5 + $0x30] sm:$0xff]   ;;  %v463_v28 = vld [vmem:[%s678_s5 + $0x38] sm:$0xff]   ;;  %s342_s5 = sshll.u32 %s519_s26, 4  ;;  %s343_s5 = int_to_ptr.vmem [resolvable:$true] %s342_s5 }
  0x19   :  { %397 = vmatpush3.bf16.msra.mxu0 %v447_v2  ;;  %405 = vmatpush3.bf16.msra.mxu1 %v449_v6  ;;  %v355_v29 = vld [vmem:[%s677_s4] ss:$0 sm:$0xff]  ;;  %s490_s4 = scalar_lea.vmem %s343_s5, 128  ;;  %p495_p9 = scmp.lt.s32.totalorder %s343_s5, %s343_s5 }
  0x1a   :  { %422 = vmatprep.subr.bf16.mxu0 %v517_v0  ;;  %406 = vmatprep.subr.bf16.mxu1 %v517_v0  ;;  %v364_v37 = vld [vmem:[%s679_s6] ss:$0 sm:$0xff]  ;;  %p491_p8 = scmp.ne.s32.totalorder %s343_s5, %s490_s4  ;;  %p496_p10 = scmp.lt.s32.totalorder %s490_s4, %s490_s4 }
  0x1c   :  { %399 = vmatmul.mubr.msk.bf16.vlgmr.msra.gmra.mrb[0].mxu0 %vm99_vm1, %v80_v5  ;;  %p497_p11 = por %p496_p10, %p495_p9 }
  0x1d   :  { %438 = vmatprep.mubr.msk.bf16.mxu0 %vm518_vm0, %v517_v0  ;;  %407 = vmatpush3.bf16.msra.mxu1 %v450_v7 }
  0x1e   :  { %408 = vmatprep.subr.bf16.mxu1 %v517_v0  ;;  %423 = vmatpush3.bf16.msra.mxu0 %v456_v13  ;;  %p498_p12 = pnand %p497_p11, %p491_p8 }
  0x1f   :  { %424 = vmatprep.subr.bf16.mxu0 %v517_v0 }
  0x21   :  { %409 = vmatpush3.bf16.msra.mxu1 %v451_v8 }
  0x22   :  { %410 = vmatprep.subr.bf16.mxu1 %v517_v0  ;;  %425 = vmatpush3.bf16.msra.mxu0 %v457_v14 }
  0x23   :  { %426 = vmatprep.subr.bf16.mxu0 %v517_v0 }
  0x25   :  { %411 = vmatpush3.bf16.msra.mxu1 %v452_v9 }
  0x26   :  { %412 = vmatprep.subr.bf16.mxu1 %v517_v0  ;;  %427 = vmatpush3.bf16.msra.mxu0 %v458_v15 }
  0x27   :  { %428 = vmatprep.subr.bf16.mxu0 %v517_v0 }
  0x29   :  { %413 = vmatpush3.bf16.msra.mxu1 %v453_v10 }
  0x2a   :  { %414 = vmatprep.subr.bf16.mxu1 %v517_v0  ;;  %429 = vmatpush3.bf16.msra.mxu0 %v459_v16 }
  0x2b   :  { %430 = vmatprep.subr.bf16.mxu0 %v517_v0 }
  0x2d   :  { %415 = vmatpush3.bf16.msra.mxu1 %v454_v11 }
  0x2e   :  { %416 = vmatprep.subr.bf16.mxu1 %v517_v0  ;;  %431 = vmatpush3.bf16.msra.mxu0 %v460_v25 }
  0x2f   :  { %432 = vmatprep.subr.bf16.mxu0 %v517_v0 }
  0x31   :  { %417 = vmatpush3.bf16.msra.mxu1 %v455_v12 }
  0x32   :  { %433 = vmatpush3.bf16.msra.mxu0 %v461_v26 }
  0x33   :  { %434 = vmatprep.subr.bf16.mxu0 %v517_v0 }
  0x36   :  { %435 = vmatpush3.bf16.msra.mxu0 %v462_v27 }
  0x37   :  { %436 = vmatprep.subr.bf16.mxu0 %v517_v0 }
  0x3a   :  { %437 = vmatpush3.bf16.msra.mxu0 %v463_v28 }
  0xef   :  { %v137_v18 = vpop.f32.mrb[0].mxu0 }
  0xf0   :  { %v138_v19 = vadd.f32 %v351_v17, %v137_v18  ;;  %v400_v20 = vpop.f32.mrb[1].mxu0 }
  0xf1   :  { %v140_v21 = vpop.f32.mrb[2].mxu0 }
  0xf2   :  { %464 = vtanh.f32 %v138_v19  ;;  %v401_v22 = vpop.f32.mrb[3].mxu0 }
  0xfc   :  { %v465_v23 = vpop.eup %464 }
  0xfd   :  { %v144_v24 = vpack.c.bf16 %v465_v23, %v465_v23 }
  0xff   :  { %419 = vmatmul.mubr.bf16.vlgmr.msra.gmra.mrb[0].mxu1 %v144_v24 }
 0x1d2   :  { %v233_v30 = vpop.f32.mrb[0].mxu1 }
 0x1d3   :  { %v234_v31 = vadd.f32 %v355_v29, %v233_v30  ;;  %v420_v32 = vpop.f32.mrb[1].mxu1 }
 0x1d4   :  { %v236_v33 = vpop.f32.mrb[2].mxu1 }
 0x1d5   :  { %466 = vtanh.f32 %v234_v31  ;;  %v421_v34 = vpop.f32.mrb[3].mxu1 }
 0x1df   :  { %v467_v35 = vpop.eup %466 }
 0x1e0   :  { %v240_v36 = vpack.c.bf16 %v467_v35, %v467_v35 }
 0x1e2   :  { %439 = vmatmul.mubr.bf16.vlgmr.msra.gmra.mrb[4].mxu0 %v240_v36 }
 0x2b5   :  { %v329_v38 = vpop.f32.mrb[4].mxu0 }
 0x2b6   :  { %v330_v39 = vadd.f32 %v364_v37, %v329_v38  ;;  %v440_v40 = vpop.f32.mrb[5].mxu0 }
 0x2b7   :  { %v332_v41 = vpop.f32.mrb[6].mxu0 }
 0x2b8   :  { %335 = vst.msk [vmem:[#allocation5] sm:$0xff] %vm99_vm1, %v330_v39  ;;  %v441_v42 = vpop.f32.mrb[7].mxu0 }
 0x2b9   :  { %501 = shalt.err (!%p498_p12)
}
 0x2ba   :  { %s502_s6 = scalar_lea.hbm %s680_s7, 128 }
 0x2bb   :  { %p503_p13 = scmp.ne.s32.totalorder %s680_s7, %s502_s6  ;;  %p506_p0 = scmp.lt.u32.totalorder %s502_s6, %s680_s7 }
 0x2bd   :  { %p508_p1 = pnand %p506_p0, %p503_p13 }
 0x2bf   :  { %511 = shalt.err (!%p508_p1)
}
 0x2c0   :  { %345 = dma.vmem_to_hbm [thread:$0]  %s343_s5, 128, %s680_s7, [#allocation4]  }
 0x2c1   :  { %514 = dma.done.wait [#allocation4], 128  }
 0x2c2   :  { %515 = vsyncadd [#allocation4], 4294967168 }
 0x2c3   :  { %349 = vsyncpa [#allocation3], 1 }
 0x2c4   :  { %350 = vsyncpa [#allocation4], 1 }

</bundles_post_ra>
